<compile_context>
chip_gen: v7x
topology: tpu7x:2x2x1
jax: 0.10.0
libtpu: 0.0.40
codegen_flags: <defaults>
</compile_context>

<pallas_src>
import functools

import jax
import jax.numpy as jnp
from jax.experimental import pallas as pl
from jax.experimental.pallas import tpu as pltpu


def _round_up(x, m):
    return (x + m - 1) // m * m


def _conv2_kernel(x_ref, b_ref, bias_ref, o_ref, *, tile_m):
    # x_ref:    (M_pad + 2, K)   lane-packed, batch+row stacked, padded input (resident)
    # b_ref:    (3, K, W*C2)     banded weights (1x1 branch + BN scale folded in)
    # bias_ref: (1, W*C2)        folded BN bias, tiled across W
    # o_ref:    (tile_m, W*C2)   lane-dense output row strip
    row0 = pl.multiple_of(pl.program_id(0) * tile_m, tile_m)

    # 3x3 conv as 3 row-shifted matmuls; single f32 accumulator += chain.
    acc = jnp.dot(x_ref[pl.ds(row0, tile_m), :], b_ref[0],
                  preferred_element_type=jnp.float32)
    acc += jnp.dot(x_ref[pl.ds(row0 + 1, tile_m), :], b_ref[1],
                   preferred_element_type=jnp.float32)
    acc += jnp.dot(x_ref[pl.ds(row0 + 2, tile_m), :], b_ref[2],
                   preferred_element_type=jnp.float32)

    # Folded eval-mode BatchNorm bias + SiLU, both in f32.
    y = acc + bias_ref[...]
    y = y * jax.nn.sigmoid(y)
    o_ref[...] = y.astype(o_ref.dtype)


def conv2_forward(x_nchw, w3_oihw, w1_oihw, gamma, beta, running_mean,
                  running_var, eps=1e-5, compute_dtype=None, max_tile_m=256):
    """Conv2.forward: SiLU(BN(conv3x3(x) + conv1x1(x))). Input/output NCHW."""
    N, C1, H, W = x_nchw.shape
    C2 = w3_oihw.shape[0]
    Hp, WP = H + 2, W + 2
    lanes_in = WP * C1
    lanes_pad = _round_up(lanes_in, 128)          # unmasked loads / fuller MXU K
    n_out_lanes = W * C2                          # 128 for the test shape

    # ---- weight / parameter folding (trace-time, tiny tensors) ----
    w3 = jnp.transpose(w3_oihw, (2, 3, 1, 0)).astype(jnp.float32)        # (3,3,C1,C2) HWIO
    w1 = jnp.transpose(w1_oihw[:, :, 0, 0], (1, 0)).astype(jnp.float32)  # (C1,C2)
    w_fused = w3.at[1, 1].add(w1)                 # RepConv: fold 1x1 into centre tap
    inv_std = 1.0 / jnp.sqrt(running_var.astype(jnp.float32) + eps)
    scale = gamma.astype(jnp.float32) * inv_std                          # (C2,)
    w_fused = w_fused * scale[None, None, None, :]                       # fold BN scale
    bias = beta.astype(jnp.float32) - running_mean.astype(jnp.float32) * scale

    # Banded weight matrices: B[dy, jw*C1+ci, w*C2+co] = w_fused[dy, jw-w, ci, co]
    # for 0 <= jw-w <= 2, else 0.  (jw indexes padded input columns.)
    jw = jnp.arange(WP)
    wo = jnp.arange(W)
    dxm = jw[:, None] - wo[None, :]                        # (WP, W)
    mask = ((dxm >= 0) & (dxm <= 2)).astype(jnp.float32)
    dx_idx = jnp.clip(dxm, 0, 2)
    sel = w_fused[:, dx_idx] * mask[None, :, :, None, None]   # (3, WP, W, C1, C2)
    B = jnp.transpose(sel, (0, 1, 3, 2, 4)).reshape(3, lanes_in, n_out_lanes)
    if lanes_pad > lanes_in:
        B = jnp.pad(B, ((0, 0), (0, lanes_pad - lanes_in), (0, 0)))
    bias_tiled = jnp.tile(bias, W).reshape(1, n_out_lanes)

    # ---- tile sizing (fold batch into the stacked row axis) ----
    sub = 16 if compute_dtype == jnp.bfloat16 else 8
    total_rows = N * Hp
    tile_m = min(_round_up(total_rows, sub), max_tile_m)
    m_pad = _round_up(total_rows, tile_m)
    n_strips = m_pad // tile_m

    # ---- input layout plumbing: NCHW -> padded NHWC -> stacked lane-packed 2D ----
    x_nhwc = jnp.transpose(x_nchw, (0, 2, 3, 1))
    x_pad = jnp.pad(x_nhwc, ((0, 0), (1, 1), (1, 1), (0, 0)))
    x2d = x_pad.reshape(N * Hp, lanes_in)
    x_stack = jnp.pad(x2d, ((0, m_pad + 2 - total_rows), (0, lanes_pad - lanes_in)))

    if compute_dtype is not None:     # e.g. jnp.bfloat16 on v6e/v7x
        x_stack = x_stack.astype(compute_dtype)
        B = B.astype(compute_dtype)

    op_itemsize = jnp.dtype(compute_dtype or jnp.float32).itemsize
    out_itemsize = jnp.dtype(x_nchw.dtype).itemsize
    blk_bytes = ((m_pad + 2) * lanes_pad * op_itemsize      # resident x slab
                 + 3 * lanes_pad * n_out_lanes * op_itemsize  # banded weights
                 + n_out_lanes * 4                           # bias
                 + tile_m * n_out_lanes * out_itemsize)      # output strip
    vmem_limit = int(min(96 << 20, max(32 << 20, 2 * blk_bytes + (8 << 20))))

    kernel = functools.partial(_conv2_kernel, tile_m=tile_m)
    out2d = pl.pallas_call(
        kernel,
        out_shape=jax.ShapeDtypeStruct((m_pad, n_out_lanes), x_nchw.dtype),
        grid_spec=pltpu.PrefetchScalarGridSpec(
            num_scalar_prefetch=0,
            grid=(n_strips,),
            in_specs=[
                pl.BlockSpec((m_pad + 2, lanes_pad), lambda s: (0, 0)),
                pl.BlockSpec((3, lanes_pad, n_out_lanes), lambda s: (0, 0, 0)),
                pl.BlockSpec((1, n_out_lanes), lambda s: (0, 0)),
            ],
            out_specs=pl.BlockSpec((tile_m, n_out_lanes), lambda s: (s, 0)),
        ),
        compiler_params=pltpu.CompilerParams(
            dimension_semantics=("parallel",),
            vmem_limit_bytes=vmem_limit),
    )(x_stack, B, bias_tiled)

    # Valid rows are h < H inside each stacked (H+2)-row block; the rest
    # (batch-boundary / pad rows) were computed-and-discarded.
    out = out2d[:total_rows].reshape(N, Hp, n_out_lanes)[:, :H]
    out = out.reshape(N, H, W, C2)
    return jnp.transpose(out, (0, 3, 1, 2))                               # back to NCHW


def conv2_reference(x, w3, w1, gamma, beta, mean, var, eps=1e-5):
    """Pure-JAX reference (XLA convs) for validation."""
    hi = jax.lax.Precision.HIGHEST
    y3 = jax.lax.conv_general_dilated(
        x, w3, window_strides=(1, 1), padding=((1, 1), (1, 1)),
        dimension_numbers=('NCHW', 'OIHW', 'NCHW'), precision=hi)
    y1 = jax.lax.conv_general_dilated(
        x, w1, window_strides=(1, 1), padding=((0, 0), (0, 0)),
        dimension_numbers=('NCHW', 'OIHW', 'NCHW'), precision=hi)
    y = y3 + y1
    c = lambda v: v[None, :, None, None]
    y = (y - c(mean)) / jnp.sqrt(c(var) + eps) * c(gamma) + c(beta)
    return y * jax.nn.sigmoid(y)


if __name__ == "__main__":
    key = jax.random.PRNGKey(0)
    kx, k3, k1, kg, kb, km, kv = jax.random.split(key, 7)

    # Conv2(c1=4, c2=8, k=3, s=1) at small shapes.
    N, C1, C2, H, W = 2, 4, 8, 16, 16

    x = jax.random.normal(kx, (N, C1, H, W), jnp.float32)
    w3 = jax.random.normal(k3, (C2, C1, 3, 3), jnp.float32) * 0.1   # conv.weight  (OIHW)
    w1 = jax.random.normal(k1, (C2, C1, 1, 1), jnp.float32) * 0.1   # cv2.weight   (OIHW)
    gamma = jax.random.normal(kg, (C2,), jnp.float32) * 0.1 + 1.0   # bn.weight
    beta = jax.random.normal(kb, (C2,), jnp.float32) * 0.1          # bn.bias
    running_mean = jax.random.normal(km, (C2,), jnp.float32) * 0.1  # bn.running_mean
    running_var = jax.random.uniform(kv, (C2,), jnp.float32,
                                     minval=0.5, maxval=1.5)        # bn.running_var

    ref = jax.block_until_ready(
        conv2_reference(x, w3, w1, gamma, beta, running_mean, running_var))

    # f32 operand path (default).
    out = jax.block_until_ready(
        conv2_forward(x, w3, w1, gamma, beta, running_mean, running_var))
    assert out.shape == (N, C2, H, W), out.shape
    assert jnp.allclose(out, ref, atol=1e-3, rtol=1e-3), \
        float(jnp.max(jnp.abs(out - ref)))

    # bf16 operand path (recommended default on v6e/v7x): f32 accumulation,
    # relaxed tolerance.
    out_bf16 = jax.block_until_ready(
        conv2_forward(x, w3, w1, gamma, beta, running_mean, running_var,
                      compute_dtype=jnp.bfloat16))
    assert out_bf16.shape == (N, C2, H, W), out_bf16.shape
    assert jnp.allclose(out_bf16, ref, atol=1e-1, rtol=1e-1), \
        float(jnp.max(jnp.abs(out_bf16 - ref)))

    print("KERNEL_OK")
</pallas_src>

<mosaic_0001>
module attributes {stable_mosaic.version = 11 : i64} {
  func.func @_conv2_kernel(%arg0: i32, %arg1: memref<42x128xf32, #tpu.memory_space<vmem>>, %arg2: memref<3x128x128xf32, #tpu.memory_space<vmem>>, %arg3: memref<1x128xf32, #tpu.memory_space<vmem>>, %arg4: memref<40x128xf32, #tpu.memory_space<vmem>>) attributes {dimension_semantics = [#tpu.dimension_semantics<parallel>], iteration_bounds = array<i64: 1>, scalar_prefetch = 0 : i64, scratch_operands = 0 : i64, tpu.core_type = #tpu.core_type<tc>, window_params = [{pipeline_mode = #tpu.pipeline_mode<synchronous>, transform_indices = @transform_0, window_bounds = array<i64: 42, 128>}, {pipeline_mode = #tpu.pipeline_mode<synchronous>, transform_indices = @transform_1, window_bounds = array<i64: 3, 128, 128>}, {pipeline_mode = #tpu.pipeline_mode<synchronous>, transform_indices = @transform_2, window_bounds = array<i64: 1, 128>}, {transform_indices = @transform_3, window_bounds = array<i64: 40, 128>}]} {
    %c40_i32 = arith.constant 40 : i32
    %0 = arith.muli %arg0, %c40_i32 : i32
    %1 = tpu.assume_multiple %0, 40 : i32
    %2 = arith.index_cast %1 : i32 to index
    %c0 = arith.constant 0 : index
    %3 = vector.load %arg1[%2, %c0] : memref<42x128xf32, #tpu.memory_space<vmem>>, vector<40x128xf32>
    %c0_0 = arith.constant 0 : index
    %c0_1 = arith.constant 0 : index
    %c0_2 = arith.constant 0 : index
    %4 = vector.load %arg2[%c0_0, %c0_1, %c0_2] : memref<3x128x128xf32, #tpu.memory_space<vmem>>, vector<1x128x128xf32>
    %5 = vector.shape_cast %4 : vector<1x128x128xf32> to vector<128x128xf32>
    %cst = arith.constant dense<0.000000e+00> : vector<40x128xf32>
    %6 = tpu.matmul %3, %5, %cst {dimension_numbers = #tpu.dot_dimension_numbers<[1], [0], [0], [1], [0, 0, 1, 1], [], []>} : vector<40x128xf32>, vector<128x128xf32>, vector<40x128xf32> -> vector<40x128xf32>
    %c1_i32 = arith.constant 1 : i32
    %7 = arith.addi %1, %c1_i32 : i32
    %8 = arith.index_cast %7 : i32 to index
    %c0_3 = arith.constant 0 : index
    %9 = vector.load %arg1[%8, %c0_3] : memref<42x128xf32, #tpu.memory_space<vmem>>, vector<40x128xf32>
    %c1 = arith.constant 1 : index
    %c0_4 = arith.constant 0 : index
    %c0_5 = arith.constant 0 : index
    %10 = vector.load %arg2[%c1, %c0_4, %c0_5] : memref<3x128x128xf32, #tpu.memory_space<vmem>>, vector<1x128x128xf32>
    %11 = vector.shape_cast %10 : vector<1x128x128xf32> to vector<128x128xf32>
    %cst_6 = arith.constant dense<0.000000e+00> : vector<40x128xf32>
    %12 = tpu.matmul %9, %11, %cst_6 {dimension_numbers = #tpu.dot_dimension_numbers<[1], [0], [0], [1], [0, 0, 1, 1], [], []>} : vector<40x128xf32>, vector<128x128xf32>, vector<40x128xf32> -> vector<40x128xf32>
    %13 = arith.addf %6, %12 : vector<40x128xf32>
    %c2_i32 = arith.constant 2 : i32
    %14 = arith.addi %1, %c2_i32 : i32
    %15 = arith.index_cast %14 : i32 to index
    %c0_7 = arith.constant 0 : index
    %16 = vector.load %arg1[%15, %c0_7] : memref<42x128xf32, #tpu.memory_space<vmem>>, vector<40x128xf32>
    %c2 = arith.constant 2 : index
    %c0_8 = arith.constant 0 : index
    %c0_9 = arith.constant 0 : index
    %17 = vector.load %arg2[%c2, %c0_8, %c0_9] : memref<3x128x128xf32, #tpu.memory_space<vmem>>, vector<1x128x128xf32>
    %18 = vector.shape_cast %17 : vector<1x128x128xf32> to vector<128x128xf32>
    %cst_10 = arith.constant dense<0.000000e+00> : vector<40x128xf32>
    %19 = tpu.matmul %16, %18, %cst_10 {dimension_numbers = #tpu.dot_dimension_numbers<[1], [0], [0], [1], [0, 0, 1, 1], [], []>} : vector<40x128xf32>, vector<128x128xf32>, vector<40x128xf32> -> vector<40x128xf32>
    %20 = arith.addf %13, %19 : vector<40x128xf32>
    %c0_11 = arith.constant 0 : index
    %c0_12 = arith.constant 0 : index
    %21 = vector.load %arg3[%c0_11, %c0_12] : memref<1x128xf32, #tpu.memory_space<vmem>>, vector<1x128xf32>
    %22 = vector.broadcast %21 : vector<1x128xf32> to vector<40x128xf32>
    %23 = arith.addf %20, %22 : vector<40x128xf32>
    %24 = arith.negf %23 : vector<40x128xf32>
    %25 = math.exp %24 : vector<40x128xf32>
    %cst_13 = arith.constant 1.000000e+00 : f32
    %26 = vector.broadcast %cst_13 : f32 to vector<40x128xf32>
    %27 = arith.addf %26, %25 : vector<40x128xf32>
    %28 = arith.divf %26, %27 : vector<40x128xf32>
    %29 = arith.mulf %23, %28 : vector<40x128xf32>
    %c0_14 = arith.constant 0 : index
    %c0_15 = arith.constant 0 : index
    %30 = vector.load %arg4[%c0_14, %c0_15] : memref<40x128xf32, #tpu.memory_space<vmem>>, vector<40x128xf32>
    tpu.vector_store %arg4[%c0_14, %c0_15], %29 {strides = array<i32>} : memref<40x128xf32, #tpu.memory_space<vmem>>, vector<40x128xf32>,
    return
  }
  func.func @transform_0(%arg0: i32) -> (i32, i32) {
    %c0_i32 = arith.constant 0 : i32
    %c0_i32_0 = arith.constant 0 : i32
    %c0_i32_1 = arith.constant 0 : i32
    return %c0_i32, %c0_i32_0 : i32, i32
  }
  func.func @transform_1(%arg0: i32) -> (i32, i32, i32) {
    %c0_i32 = arith.constant 0 : i32
    %c0_i32_0 = arith.constant 0 : i32
    %c0_i32_1 = arith.constant 0 : i32
    %c0_i32_2 = arith.constant 0 : i32
    return %c0_i32, %c0_i32_0, %c0_i32_1 : i32, i32, i32
  }
  func.func @transform_2(%arg0: i32) -> (i32, i32) {
    %c0_i32 = arith.constant 0 : i32
    %c0_i32_0 = arith.constant 0 : i32
    %c0_i32_1 = arith.constant 0 : i32
    return %c0_i32, %c0_i32_0 : i32, i32
  }
  func.func @transform_3(%arg0: i32) -> (i32, i32) {
    %c0_i32 = arith.constant 0 : i32
    %c0_i32_0 = arith.constant 0 : i32
    return %arg0, %c0_i32 : i32, i32
  }
}

</mosaic_0001>

<bundles_post_ra>
// kernel: tpu_custom_call.1
= control target key start
LH: loop header
LB: loop body
LE: loop exit
PB: predicated region body
PF: predicated region fallthrough
CT: control target
= control target key end

     0   :  { %8 = vsyncpa [#allocation3], 0  ;;  %s997_s0 = inlined_call_operand.hbm [shape: f32[42,128], index: 0, kind: input, shape index: {}]   ;;  %s998_s1 = inlined_call_operand.hbm [shape: f32[3,128,128], index: 1, kind: input, shape index: {}]   ;;  %s999_s2 = inlined_call_operand.vmem [shape: f32[1,128], index: 2, kind: input, shape index: {}]   ;;  %s1000_s3 = inlined_call_operand.hbm [shape: f32[40,128], index: 3, kind: output, shape index: {}]  }
   0x1   :  { %9 = vsyncpa [#allocation6], 0 }
   0x2   :  { %10 = vsyncpa [#allocation4], 0  ;;  %s859_s12 = smov [#allocation2]   ;;  %s787_s16 = scalar_lea.hbm %s997_s0, 768 }
   0x3   :  { %s16_s13 = sshll.u32 %s859_s12, 4  ;;  %p788_p0 = scmp.ne.s32.totalorder %s997_s0, %s787_s16  ;;  %s17_s13 = int_to_ptr.vmem [resolvable:$true] %s16_s13 }
   0x4   :  { %p791_p1 = scmp.lt.u32.totalorder %s787_s16, %s997_s0 }
   0x6   :  { %p793_p2 = pnand %p791_p1, %p788_p0 }
   0x8   :  { %796 = shalt.err (!%p793_p2)
}
   0x9   :  { %s797_s21 = scalar_lea.vmem %s17_s13, 768  ;;  %p802_p4 = scmp.lt.s32.totalorder %s17_s13, %s17_s13 }
   0xa   :  { %p798_p3 = scmp.ne.s32.totalorder %s17_s13, %s797_s21  ;;  %p803_p5 = scmp.lt.s32.totalorder %s797_s21, %s797_s21 }
   0xc   :  { %p804_p6 = por %p803_p5, %p802_p4 }
   0xe   :  { %p805_p7 = pnand %p804_p6, %p798_p3 }
  0x10   :  { %808 = shalt.err (!%p805_p7)
}
  0x11   :  { %s860_s22 = smov 128   ;;  %s861_s23 = smov 8  }
  0x12   :  { %22 = dma.hbm_to_vmem [thread:$0]  %s997_s0, 768, %s17_s13, [#allocation3], %s860_s22, %s860_s22, %s861_s23  }
  0x13   :  { %s862_s26 = smov [#allocation5]   ;;  %s809_s30 = scalar_lea.hbm %s998_s1, 6144 }
  0x14   :  { %s28_s27 = sshll.u32 %s862_s26, 4  ;;  %p810_p8 = scmp.ne.s32.totalorder %s998_s1, %s809_s30  ;;  %s29_s27 = int_to_ptr.vmem [resolvable:$true] %s28_s27 }
  0x15   :  { %p813_p9 = scmp.lt.u32.totalorder %s809_s30, %s998_s1 }
  0x17   :  { %p815_p10 = pnand %p813_p9, %p810_p8 }
  0x19   :  { %818 = shalt.err (!%p815_p10)
}
  0x1a   :  { %s819_s8 = scalar_lea.vmem %s29_s27, 6144  ;;  %p824_p12 = scmp.lt.s32.totalorder %s29_s27, %s29_s27 }
  0x1b   :  { %p820_p11 = scmp.ne.s32.totalorder %s29_s27, %s819_s8  ;;  %p825_p13 = scmp.lt.s32.totalorder %s819_s8, %s819_s8 }
  0x1d   :  { %p826_p0 = por %p825_p13, %p824_p12 }
  0x1f   :  { %p827_p1 = pnand %p826_p0, %p820_p11 }
  0x21   :  { %830 = shalt.err (!%p827_p1)
}
  0x22   :  { %34 = dma.hbm_to_vmem [thread:$0]  %s998_s1, 6144, %s29_s27, [#allocation6], %s860_s22, %s860_s22, %s861_s23  }
  0x23   :  { %853 = dma.done.wait [#allocation3], 768  }
  0x24   :  { %854 = vsyncadd [#allocation3], 4294966528 }
  0x25   :  { %855 = dma.done.wait [#allocation6], 6144  }
  0x26   :  { %856 = vsyncadd [#allocation6], 4294961152  ;;  %v863_v0 = vmov 0.0|0.0   ;;  %vm864_vm0 = vmmov 0   ;;  %v865_v1 = vmov 0.0   ;;  %v74_v2 = vld [vmem:[#allocation5 + $0x80] sm:$0xff] }
  0x27   :  { %671 = vmatprep.subr.bf16.mxu0 %v863_v0  ;;  %695 = vmatprep.subr.bf16.mxu1 %v863_v0  ;;  %v75_v3 = vld [vmem:[#allocation5 + $0x88] sm:$0xff]  ;;  %v50_v4 = vld [vmem:[#allocation5] sm:$0xff]  ;;  %v76_v7 = vld [vmem:[#allocation5 + $0x90] sm:$0xff] }
  0x28   :  { %562 = vmatprep.mubr.msk.f32.mxu0 %vm864_vm0, %v865_v1  ;;  %609 = vmatprep.mubr.msk.f32.mxu1 %vm864_vm0, %v865_v1  ;;  %v672_v5 = vpack.c.bf16 %v75_v3, %v74_v2  ;;  %v51_v6 = vld [vmem:[#allocation5 + $0x8] sm:$0xff]  ;;  %v77_v8 = vld [vmem:[#allocation5 + $0x98] sm:$0xff]  ;;  %v52_v10 = vld [vmem:[#allocation5 + $0x10] sm:$0xff] }
  0x29   :  { %v696_v9 = vpack.c.bf16 %v51_v6, %v50_v4  ;;  %v53_v11 = vld [vmem:[#allocation5 + $0x18] sm:$0xff]  ;;  %v675_v12 = vpack.c.bf16 %v77_v8, %v76_v7  ;;  %v78_v14 = vld [vmem:[#allocation5 + $0xa0] sm:$0xff]  ;;  %v79_v15 = vld [vmem:[#allocation5 + $0xa8] sm:$0xff] }
  0x2a   :  { %673 = vmatpush3.bf16.msra.mxu0 %v672_v5  ;;  %v699_v13 = vpack.c.bf16 %v53_v11, %v52_v10  ;;  %v54_v16 = vld [vmem:[#allocation5 + $0x20] sm:$0xff]  ;;  %v55_v17 = vld [vmem:[#allocation5 + $0x28] sm:$0xff]  ;;  %v678_v18 = vpack.c.bf16 %v79_v15, %v78_v14  ;;  %v80_v20 = vld [vmem:[#allocation5 + $0xb0] sm:$0xff] }
  0x2b   :  { %697 = vmatpush3.bf16.msra.mxu1 %v696_v9  ;;  %674 = vmatprep.subr.bf16.mxu0 %v863_v0  ;;  %v702_v19 = vpack.c.bf16 %v55_v17, %v54_v16  ;;  %v81_v21 = vld [vmem:[#allocation5 + $0xb8] sm:$0xff]  ;;  %v56_v22 = vld [vmem:[#allocation5 + $0x30] sm:$0xff]  ;;  %v82_v26 = vld [vmem:[#allocation5 + $0xc0] sm:$0xff] }
  0x2c   :  { %698 = vmatprep.subr.bf16.mxu1 %v863_v0  ;;  %v57_v23 = vld [vmem:[#allocation5 + $0x38] sm:$0xff]  ;;  %v681_v24 = vpack.c.bf16 %v81_v21, %v80_v20  ;;  %v83_v27 = vld [vmem:[#allocation5 + $0xc8] sm:$0xff]  ;;  %v58_v28 = vld [vmem:[#allocation5 + $0x40] sm:$0xff] }
  0x2d   :  { %v705_v25 = vpack.c.bf16 %v57_v23, %v56_v22  ;;  %v59_v29 = vld [vmem:[#allocation5 + $0x48] sm:$0xff]  ;;  %v684_v30 = vpack.c.bf16 %v83_v27, %v82_v26  ;;  %v84_v32 = vld [vmem:[#allocation5 + $0xd0] sm:$0xff]  ;;  %v85_v33 = vld [vmem:[#allocation5 + $0xd8] sm:$0xff] }
  0x2e   :  { %676 = vmatpush3.bf16.msra.mxu0 %v675_v12  ;;  %v708_v31 = vpack.c.bf16 %v59_v29, %v58_v28  ;;  %v60_v34 = vld [vmem:[#allocation5 + $0x50] sm:$0xff]  ;;  %v61_v35 = vld [vmem:[#allocation5 + $0x58] sm:$0xff]  ;;  %v687_v36 = vpack.c.bf16 %v85_v33, %v84_v32  ;;  %v86_v38 = vld [vmem:[#allocation5 + $0xe0] sm:$0xff] }
  0x2f   :  { %700 = vmatpush3.bf16.msra.mxu1 %v699_v13  ;;  %677 = vmatprep.subr.bf16.mxu0 %v863_v0  ;;  %v711_v37 = vpack.c.bf16 %v61_v35, %v60_v34  ;;  %v87_v39 = vld [vmem:[#allocation5 + $0xe8] sm:$0xff]  ;;  %v62_v40 = vld [vmem:[#allocation5 + $0x60] sm:$0xff]  ;;  %v88_v44 = vld [vmem:[#allocation5 + $0xf0] sm:$0xff] }
  0x30   :  { %701 = vmatprep.subr.bf16.mxu1 %v863_v0  ;;  %v63_v41 = vld [vmem:[#allocation5 + $0x68] sm:$0xff]  ;;  %v690_v42 = vpack.c.bf16 %v87_v39, %v86_v38  ;;  %v89_v45 = vld [vmem:[#allocation5 + $0xf8] sm:$0xff]  ;;  %v64_v46 = vld [vmem:[#allocation5 + $0x70] sm:$0xff] }
  0x31   :  { %v714_v43 = vpack.c.bf16 %v63_v41, %v62_v40  ;;  %v65_v47 = vld [vmem:[#allocation5 + $0x78] sm:$0xff]  ;;  %v693_v48 = vpack.c.bf16 %v89_v45, %v88_v44  ;;  %v278_v50 = vld [vmem:[#allocation5 + $0x100] sm:$0xff]  ;;  %v279_v51 = vld [vmem:[#allocation5 + $0x108] sm:$0xff] }
  0x32   :  { %679 = vmatpush3.bf16.msra.mxu0 %v678_v18  ;;  %v717_v49 = vpack.c.bf16 %v65_v47, %v64_v46  ;;  %v68_v52 = vld [vmem:[#allocation2 + $0x1] sm:$0xff]  ;;  %v720_v53 = vpack.c.bf16 %v279_v51, %v278_v50  ;;  %v69_v58 = vld [vmem:[#allocation2 + $0x9] sm:$0xff]  ;;  %v283_v60 = vld [vmem:[#allocation5 + $0x128] sm:$0xff] }
  0x33   :  { %703 = vmatpush3.bf16.msra.mxu1 %v702_v19  ;;  %680 = vmatprep.subr.bf16.mxu0 %v863_v0  ;;  %v45_v54 = vld [vmem:[#allocation2] sm:$0xff]  ;;  %v281_v56 = vld [vmem:[#allocation5 + $0x118] sm:$0xff]  ;;  %v282_v59 = vld [vmem:[#allocation5 + $0x120] sm:$0xff] }
  0x34   :  { %704 = vmatprep.subr.bf16.mxu1 %v863_v0  ;;  %v280_v55 = vld [vmem:[#allocation5 + $0x110] sm:$0xff]  ;;  %v46_v61 = vld [vmem:[#allocation2 + $0x8] sm:$0xff]  ;;  %v726_v62 = vpack.c.bf16 %v283_v60, %v282_v59  ;;  %v70_v63 = vld [vmem:[#allocation2 + $0x11] sm:$0xff] }
  0x35   :  { %v723_v57 = vpack.c.bf16 %v281_v56, %v280_v55  ;;  %v284_v2 = vld [vmem:[#allocation5 + $0x130] sm:$0xff]  ;;  %v285_v3 = vld [vmem:[#allocation5 + $0x138] sm:$0xff]  ;;  %v47_v4 = vld [vmem:[#allocation2 + $0x10] sm:$0xff] }
  0x36   :  { %682 = vmatpush3.bf16.msra.mxu0 %v681_v24  ;;  %v729_v5 = vpack.c.bf16 %v285_v3, %v284_v2  ;;  %v71_v6 = vld [vmem:[#allocation2 + $0x19] sm:$0xff]  ;;  %v286_v7 = vld [vmem:[#allocation5 + $0x140] sm:$0xff]  ;;  %v72_v11 = vld [vmem:[#allocation2 + $0x21] sm:$0xff] }
  0x37   :  { %706 = vmatpush3.bf16.msra.mxu1 %v705_v25  ;;  %683 = vmatprep.subr.bf16.mxu0 %v863_v0  ;;  %v287_v8 = vld [vmem:[#allocation5 + $0x148] sm:$0xff]  ;;  %v288_v12 = vld [vmem:[#allocation5 + $0x150] sm:$0xff]  ;;  %v289_v13 = vld [vmem:[#allocation5 + $0x158] sm:$0xff] }
  0x38   :  { %707 = vmatprep.subr.bf16.mxu1 %v863_v0  ;;  %v48_v9 = vld [vmem:[#allocation2 + $0x18] sm:$0xff]  ;;  %v732_v10 = vpack.c.bf16 %v287_v8, %v286_v7  ;;  %v49_v14 = vld [vmem:[#allocation2 + $0x20] sm:$0xff]  ;;  %v735_v15 = vpack.c.bf16 %v289_v13, %v288_v12  ;;  %v290_v16 = vld [vmem:[#allocation5 + $0x160] sm:$0xff] }
  0x39   :  { %v291_v17 = vld [vmem:[#allocation5 + $0x168] sm:$0xff]  ;;  %v292_v19 = vld [vmem:[#allocation5 + $0x170] sm:$0xff]  ;;  %v293_v20 = vld [vmem:[#allocation5 + $0x178] sm:$0xff] }
  0x3a   :  { %685 = vmatpush3.bf16.msra.mxu0 %v684_v30  ;;  %v738_v18 = vpack.c.bf16 %v291_v17, %v290_v16  ;;  %v741_v21 = vpack.c.bf16 %v293_v20, %v292_v19  ;;  %v272_v22 = vld [vmem:[#allocation2 + $0x2] sm:$0xff]  ;;  %v275_v23 = vld [vmem:[#allocation2 + $0x1a] sm:$0xff]  ;;  %v273_v24 = vld [vmem:[#allocation2 + $0xa] sm:$0xff] }
  0x3b   :  { %709 = vmatpush3.bf16.msra.mxu1 %v708_v31  ;;  %686 = vmatprep.subr.bf16.mxu0 %v863_v0  ;;  %v276_v25 = vld [vmem:[#allocation2 + $0x22] sm:$0xff]  ;;  %v461_v51 = vld [vmem:[%s999_s2] ss:$0 sm:$0xff]  ;;  %s866_s2 = smov [#allocation7]  }
  0x3c   :  { %710 = vmatprep.subr.bf16.mxu1 %v863_v0  ;;  %s446_s11 = sshll.u32 %s866_s2, 4  ;;  %s447_s11 = int_to_ptr.vmem [resolvable:$true] %s446_s11 }
  0x3d   :  { %s831_s12 = scalar_lea.vmem %s447_s11, 640  ;;  %p836_p3 = scmp.lt.s32.totalorder %s447_s11, %s447_s11 }
  0x3e   :  { %688 = vmatpush3.bf16.msra.mxu0 %v687_v36  ;;  %p832_p2 = scmp.ne.s32.totalorder %s447_s11, %s831_s12  ;;  %p837_p4 = scmp.lt.s32.totalorder %s831_s12, %s831_s12 }
  0x3f   :  { %712 = vmatpush3.bf16.msra.mxu1 %v711_v37  ;;  %689 = vmatprep.subr.bf16.mxu0 %v863_v0 }
  0x40   :  { %713 = vmatprep.subr.bf16.mxu1 %v863_v0  ;;  %p838_p5 = por %p837_p4, %p836_p3 }
  0x42   :  { %691 = vmatpush3.bf16.msra.mxu0 %v690_v42  ;;  %p839_p6 = pnand %p838_p5, %p832_p2 }
  0x43   :  { %715 = vmatpush3.bf16.msra.mxu1 %v714_v43  ;;  %692 = vmatprep.subr.bf16.mxu0 %v863_v0 }
  0x44   :  { %716 = vmatprep.subr.bf16.mxu1 %v863_v0 }
  0x46   :  { %694 = vmatpush3.bf16.msra.mxu0 %v693_v48 }
  0x47   :  { %718 = vmatpush3.bf16.msra.mxu1 %v717_v49  ;;  %719 = vmatprep.subr.bf16.mxu0 %v863_v0 }
  0x48   :  { %743 = vmatprep.subr.bf16.mxu1 %v863_v0 }
  0x49   :  { %563 = vmatmul.mubr.f32.vlgmr.msra.gmra.mrb[0].mxu0 %v68_v52 }
  0x4a   :  { %610 = vmatmul.mubr.f32.vlgmr.msra.gmra.mrb[0].mxu1 %v45_v54  ;;  %721 = vmatpush3.bf16.msra.mxu0 %v720_v53 }
  0x4b   :  { %751 = vmatpush3.bf16.msra.mxu1 %v720_v53  ;;  %722 = vmatprep.subr.bf16.mxu0 %v863_v0 }
  0x4c   :  { %744 = vmatprep.subr.bf16.mxu1 %v863_v0  ;;  %565 = vmatprep.mubr.msk.f32.mxu0 %vm864_vm0, %v865_v1 }
  0x4d   :  { %566 = vmatmul.mubr.f32.gmra.mrb[2].mxu0 %v69_v58  ;;  %612 = vmatprep.mubr.msk.f32.mxu1 %vm864_vm0, %v865_v1 }
  0x4e   :  { %724 = vmatpush3.bf16.msra.mxu0 %v723_v57  ;;  %613 = vmatmul.mubr.f32.gmra.mrb[2].mxu1 %v46_v61 }
  0x4f   :  { %752 = vmatpush3.bf16.msra.mxu1 %v723_v57  ;;  %725 = vmatprep.subr.bf16.mxu0 %v863_v0 }
  0x50   :  { %745 = vmatprep.subr.bf16.mxu1 %v863_v0  ;;  %568 = vmatprep.mubr.msk.f32.mxu0 %vm864_vm0, %v865_v1 }
  0x51   :  { %569 = vmatmul.mubr.f32.gmra.mrb[4].mxu0 %v70_v63  ;;  %615 = vmatprep.mubr.msk.f32.mxu1 %vm864_vm0, %v865_v1 }
  0x52   :  { %727 = vmatpush3.bf16.msra.mxu0 %v726_v62  ;;  %616 = vmatmul.mubr.f32.gmra.mrb[4].mxu1 %v47_v4 }
  0x53   :  { %753 = vmatpush3.bf16.msra.mxu1 %v726_v62  ;;  %728 = vmatprep.subr.bf16.mxu0 %v863_v0 }
  0x54   :  { %746 = vmatprep.subr.bf16.mxu1 %v863_v0  ;;  %571 = vmatprep.mubr.msk.f32.mxu0 %vm864_vm0, %v865_v1 }
  0x55   :  { %572 = vmatmul.mubr.f32.gmra.mrb[6].mxu0 %v71_v6  ;;  %618 = vmatprep.mubr.msk.f32.mxu1 %vm864_vm0, %v865_v1 }
  0x56   :  { %730 = vmatpush3.bf16.msra.mxu0 %v729_v5  ;;  %619 = vmatmul.mubr.f32.gmra.mrb[6].mxu1 %v48_v9 }
  0x57   :  { %754 = vmatpush3.bf16.msra.mxu1 %v729_v5  ;;  %731 = vmatprep.subr.bf16.mxu0 %v863_v0 }
  0x58   :  { %747 = vmatprep.subr.bf16.mxu1 %v863_v0  ;;  %574 = vmatprep.mubr.msk.f32.mxu0 %vm864_vm0, %v865_v1 }
  0x59   :  { %575 = vmatmul.mubr.f32.gmra.mrb[8].mxu0 %v72_v11  ;;  %621 = vmatprep.mubr.msk.f32.mxu1 %vm864_vm0, %v865_v1 }
  0x5a   :  { %733 = vmatpush3.bf16.msra.mxu0 %v732_v10  ;;  %622 = vmatmul.mubr.f32.gmra.mrb[8].mxu1 %v49_v14 }
  0x5b   :  { %755 = vmatpush3.bf16.msra.mxu1 %v732_v10  ;;  %734 = vmatprep.subr.bf16.mxu0 %v863_v0 }
  0x5c   :  { %748 = vmatprep.subr.bf16.mxu1 %v863_v0  ;;  %656 = vmatprep.mubr.msk.f32.mxu0 %vm864_vm0, %v865_v1 }
  0x5d   :  { %665 = vmatprep.mubr.msk.f32.mxu1 %vm864_vm0, %v865_v1 }
  0x5e   :  { %736 = vmatpush3.bf16.msra.mxu0 %v735_v15 }
  0x5f   :  { %756 = vmatpush3.bf16.msra.mxu1 %v735_v15  ;;  %737 = vmatprep.subr.bf16.mxu0 %v863_v0 }
  0x60   :  { %749 = vmatprep.subr.bf16.mxu1 %v863_v0 }
  0x62   :  { %739 = vmatpush3.bf16.msra.mxu0 %v738_v18 }
  0x63   :  { %757 = vmatpush3.bf16.msra.mxu1 %v738_v18  ;;  %740 = vmatprep.subr.bf16.mxu0 %v863_v0 }
  0x64   :  { %750 = vmatprep.subr.bf16.mxu1 %v863_v0  ;;  %v274_v0 = vld [vmem:[#allocation2 + $0x12] sm:$0xff] }
  0x66   :  { %742 = vmatpush3.bf16.msra.mxu0 %v741_v21 }
  0x67   :  { %758 = vmatpush3.bf16.msra.mxu1 %v741_v21 }
  0x69   :  { %657 = vmatmul.mubr.f32.vlgmr.msra.gmra.mrb[10].mxu0 %v272_v22 }
  0x6a   :  { %666 = vmatmul.mubr.f32.vlgmr.msra.gmra.mrb[10].mxu1 %v275_v23  ;;  %659 = vmatprep.mubr.msk.f32.mxu0 %vm864_vm0, %v865_v1 }
  0x6b   :  { %668 = vmatprep.mubr.msk.f32.mxu1 %vm864_vm0, %v865_v1 }
  0x6d   :  { %660 = vmatmul.mubr.f32.gmra.mrb[12].mxu0 %v273_v24 }
  0x6e   :  { %669 = vmatmul.mubr.f32.gmra.mrb[12].mxu1 %v276_v25  ;;  %662 = vmatprep.mubr.msk.f32.mxu0 %vm864_vm0, %v865_v1 }
  0x71   :  { %663 = vmatmul.mubr.f32.gmra.mrb[14].mxu0 %v274_v0 }
 0x11c   :  { %v156_v26 = vpop.f32.mrb[0].mxu0 }
 0x11d   :  { %v564_v27 = vpop.f32.mrb[1].mxu0  ;;  %v246_v28 = vpop.f32.mrb[0].mxu1 }
 0x11e   :  { %v247_v29 = vadd.f32 %v246_v28, %v156_v26  ;;  %v611_v30 = vpop.f32.mrb[1].mxu1 }
 0x120   :  { %v161_v31 = vpop.f32.mrb[2].mxu0 }
 0x121   :  { %v567_v32 = vpop.f32.mrb[3].mxu0  ;;  %v251_v33 = vpop.f32.mrb[2].mxu1 }
 0x122   :  { %v252_v34 = vadd.f32 %v251_v33, %v161_v31  ;;  %v614_v35 = vpop.f32.mrb[3].mxu1 }
 0x124   :  { %v166_v36 = vpop.f32.mrb[4].mxu0 }
 0x125   :  { %v570_v37 = vpop.f32.mrb[5].mxu0  ;;  %v256_v38 = vpop.f32.mrb[4].mxu1 }
 0x126   :  { %v257_v39 = vadd.f32 %v256_v38, %v166_v36  ;;  %v617_v40 = vpop.f32.mrb[5].mxu1 }
 0x128   :  { %v171_v41 = vpop.f32.mrb[6].mxu0 }
 0x129   :  { %v573_v42 = vpop.f32.mrb[7].mxu0  ;;  %v261_v1 = vpop.f32.mrb[6].mxu1 }
 0x12a   :  { %v262_v43 = vadd.f32 %v261_v1, %v171_v41  ;;  %v620_v44 = vpop.f32.mrb[7].mxu1 }
 0x12c   :  { %v176_v45 = vpop.f32.mrb[8].mxu0 }
 0x12d   :  { %v576_v46 = vpop.f32.mrb[9].mxu0  ;;  %v266_v47 = vpop.f32.mrb[8].mxu1 }
 0x12e   :  { %v267_v48 = vadd.f32 %v266_v47, %v176_v45  ;;  %v623_v49 = vpop.f32.mrb[9].mxu1 }
 0x13c   :  { %v360_v50 = vpop.f32.mrb[10].mxu0 }
 0x13d   :  { %v384_v52 = vadd.f32 %v360_v50, %v247_v29  ;;  %v375_v53 = vpop.f32.mrb[10].mxu1  ;;  %v658_v54 = vpop.f32.mrb[11].mxu0 }
 0x13e   :  { %v387_v55 = vadd.f32 %v375_v53, %v262_v43  ;;  %v667_v56 = vpop.f32.mrb[11].mxu1 }
 0x13f   :  { %v396_v57 = vadd.f32 %v461_v51, %v384_v52 }
 0x140   :  { %v399_v58 = vadd.f32 %v461_v51, %v387_v55  ;;  %v365_v59 = vpop.f32.mrb[12].mxu0 }
 0x141   :  { %v462_v60 = vmul.f32 -1.442695, %v396_v57  ;;  %v385_v61 = vadd.f32 %v365_v59, %v252_v34  ;;  %v380_v62 = vpop.f32.mrb[12].mxu1  ;;  %v661_v63 = vpop.f32.mrb[13].mxu0 }
 0x142   :  { %v465_v2 = vmul.f32 -1.442695, %v399_v58  ;;  %v388_v3 = vadd.f32 %v380_v62, %v267_v48  ;;  %v670_v4 = vpop.f32.mrb[13].mxu1 }
 0x143   :  { %767 = vpow2.f32 %v462_v60  ;;  %v397_v5 = vadd.f32 %v461_v51, %v385_v61 }
 0x144   :  { %769 = vpow2.f32 %v465_v2  ;;  %v400_v6 = vadd.f32 %v461_v51, %v388_v3  ;;  %v370_v7 = vpop.f32.mrb[14].mxu0 }
 0x145   :  { %v463_v8 = vmul.f32 -1.442695, %v397_v5  ;;  %v386_v9 = vadd.f32 %v370_v7, %v257_v39  ;;  %v664_v10 = vpop.f32.mrb[15].mxu0 }
 0x146   :  { %v466_v11 = vmul.f32 -1.442695, %v400_v6 }
 0x147   :  { %771 = vpow2.f32 %v463_v8  ;;  %v398_v12 = vadd.f32 %v461_v51, %v386_v9 }
 0x148   :  { %773 = vpow2.f32 %v466_v11 }
 0x149   :  { %v464_v13 = vmul.f32 -1.442695, %v398_v12 }
 0x14b   :  { %775 = vpow2.f32 %v464_v13 }
 0x14d   :  { %v768_v14 = vpop.eup %767 }
 0x14e   :  { %v770_v15 = vpop.eup %769  ;;  %v416_v16 = vadd.f32 1.0, %v768_v14 }
 0x14f   :  { %v419_v17 = vadd.f32 1.0, %v770_v15 }
 0x150   :  { %777 = vrcp.f32 %v416_v16 }
 0x151   :  { %v772_v18 = vpop.eup %771  ;;  %779 = vrcp.f32 %v419_v17 }
 0x152   :  { %v774_v19 = vpop.eup %773  ;;  %v417_v20 = vadd.f32 1.0, %v772_v18 }
 0x153   :  { %v420_v21 = vadd.f32 1.0, %v774_v19 }
 0x154   :  { %781 = vrcp.f32 %v417_v20 }
 0x155   :  { %v776_v22 = vpop.eup %775  ;;  %783 = vrcp.f32 %v420_v21 }
 0x156   :  { %v418_v23 = vadd.f32 1.0, %v776_v22 }
 0x158   :  { %785 = vrcp.f32 %v418_v23 }
 0x15a   :  { %v778_v24 = vpop.eup %777 }
 0x15b   :  { %v780_v25 = vpop.eup %779  ;;  %v431_v0 = vmul.f32 %v778_v24, %v396_v57 }
 0x15c   :  { %v434_v26 = vmul.f32 %v780_v25, %v399_v58 }
 0x15d   :  { %436 = vst [vmem:[#allocation7] sm:$0xff] %v431_v0 }
 0x15e   :  { %v782_v27 = vpop.eup %781  ;;  %439 = vst [vmem:[#allocation7 + $0x18] sm:$0xff] %v434_v26 }
 0x15f   :  { %v784_v28 = vpop.eup %783  ;;  %v432_v29 = vmul.f32 %v782_v27, %v397_v5 }
 0x160   :  { %v435_v30 = vmul.f32 %v784_v28, %v400_v6 }
 0x161   :  { %437 = vst [vmem:[#allocation7 + $0x8] sm:$0xff] %v432_v29 }
 0x162   :  { %v786_v31 = vpop.eup %785  ;;  %440 = vst [vmem:[#allocation7 + $0x20] sm:$0xff] %v435_v30 }
 0x163   :  { %v433_v32 = vmul.f32 %v786_v31, %v398_v12 }
 0x165   :  { %438 = vst [vmem:[#allocation7 + $0x10] sm:$0xff] %v433_v32 }
 0x166   :  { %842 = shalt.err (!%p839_p6)
}
 0x167   :  { %s843_s15 = scalar_lea.hbm %s1000_s3, 640 }
 0x168   :  { %p844_p7 = scmp.ne.s32.totalorder %s1000_s3, %s843_s15  ;;  %p847_p8 = scmp.lt.u32.totalorder %s843_s15, %s1000_s3 }
 0x16a   :  { %p849_p9 = pnand %p847_p8, %p844_p7 }
 0x16c   :  { %852 = shalt.err (!%p849_p9)
}
 0x16d   :  { %452 = dma.vmem_to_hbm [thread:$0]  %s447_s11, 640, %s1000_s3, [#allocation4], %s860_s22, %s860_s22, %s861_s23  }
 0x16e   :  { %857 = dma.done.wait [#allocation4], 640  }
 0x16f   :  { %858 = vsyncadd [#allocation4], 4294966656 }
 0x170   :  { %456 = vsyncpa [#allocation3], 1 }
 0x171   :  { %457 = vsyncpa [#allocation6], 1 }
 0x172   :  { %458 = vsyncpa [#allocation4], 1 }

</bundles_post_ra>
